<compile_context>
chip_gen: v5e
topology: v5e:2x2
jax: 0.10.0
libtpu: 0.0.40
codegen_flags: <defaults>
</compile_context>

<pallas_src>
import functools
import math

import jax
import jax.numpy as jnp
from jax.experimental import pallas as pl
from jax.experimental.pallas import tpu as pltpu


def _round_up(v, m):
    return (v + m - 1) // m * m


def _vmem_bytes(tm, n_emb):
    """Per-step VMEM footprint estimate (double-buffered streams + intermediates)."""
    return (2 * tm * n_emb * 4           # x block (f32, double-buffered)
            + 2 * tm * 4                 # label block
            + 2 * n_emb * 128 * 4        # w1 (f32, resident)
            + 2 * 2 * 128 * 128 * 2      # w2 + wd (bf16, resident)
            + 2 * 3 * 128 * 4            # biases
            + 2 * tm * 2 * 4             # logits out block
            + 2 * 8 * 128 * 4            # loss-partial out block
            + 6 * tm * 128 * 4)          # h1/h2/logits f32 + bf16 copies


def _domain_disc_kernel(n_rows, tm,
                        x_ref, lab_ref, w1_ref, b1_ref, w2_ref, b2_ref,
                        wd_ref, bd_ref,
                        logit_ref, loss_ref):
    # h_grl = flip_gradient(x) -> identity in forward.
    x = x_ref[...]                                           # (tm, n_emb) f32

    # fc1 + ReLU in f32 (full input precision; MXU is nowhere near the bottleneck).
    h1 = jnp.dot(x, w1_ref[...], preferred_element_type=jnp.float32) + b1_ref[...]
    h1 = jnp.maximum(h1, 0.0)

    # fc2 + ReLU (bf16 operands, f32 accumulation).
    h2 = jnp.dot(h1.astype(jnp.bfloat16), w2_ref[...],
                 preferred_element_type=jnp.float32) + b2_ref[...]
    h2 = jnp.maximum(h2, 0.0)

    # Domain head; wd is lane-padded to 128 columns (cols >= 2 are exactly 0)
    # so the matmul stays lane-dense, but only the 2 real columns are written.
    logits = jnp.dot(h2.astype(jnp.bfloat16), wd_ref[...],
                     preferred_element_type=jnp.float32) + bd_ref[...]
    logit_ref[...] = logits[:, :2]                           # (tm, 2) f32

    # Stable cross-entropy over the 2 real classes.
    logits2 = logits[:, :2]
    m = jnp.max(logits2, axis=-1, keepdims=True)             # (tm, 1)
    lse = m + jnp.log(jnp.sum(jnp.exp(logits2 - m), axis=-1, keepdims=True))

    lab = lab_ref[...]                                        # (tm, 1) int32, binary
    picked = jnp.where(lab == 0, logits[:, 0:1], logits[:, 1:2])

    # Mask rows past the true batch (the clipped last block reads unspecified
    # data); jnp.where keeps any NaN/Inf garbage out of the reduction.
    row = pl.program_id(0) * tm + jax.lax.broadcasted_iota(jnp.int32, (tm, 1), 0)
    per_row = jnp.where(row < n_rows, lse - picked, 0.0)

    loss_ref[...] = jnp.full((8, 128), jnp.sum(per_row), dtype=jnp.float32)


def prepare_params(params):
    """One-time parameter prep (cast + lane-pad the 2-wide head); hoisted out
    of the per-call path so it is not rebuilt on every forward."""
    wd_pad = (jnp.zeros((128, 128), jnp.float32)
              .at[:, :2].set(params["wd"]).astype(jnp.bfloat16))
    bd_pad = jnp.zeros((1, 128), jnp.float32).at[:, :2].set(params["bd"])
    return {
        "w1": params["w1"].astype(jnp.float32),
        "b1": params["b1"].astype(jnp.float32),
        "w2": params["w2"].astype(jnp.bfloat16),
        "b2": params["b2"].astype(jnp.float32),
        "wd_pad": wd_pad,
        "bd_pad": bd_pad,
    }


@functools.partial(jax.jit, static_argnames=("tm",))
def domain_discriminator_forward(x, d_label, prep, *, tm=None):
    """x: [N, n_emb] f32, d_label: [N] int (binary). prep = prepare_params(params).
    Returns (d_logit [N, 2] f32, domain_loss scalar)."""
    n, n_emb = x.shape
    if tm is None:
        if n <= 1024:
            # Small/medium N: at most ~2 tiles so a megacore part can still
            # shard the "parallel" grid axis; tiles are multiples of 16 rows.
            tm = _round_up(max(pl.cdiv(n, 2), 16), 16)
        else:
            tm = 512
    # Cap the tile so the per-step footprint stays well inside v7x's 64 MiB VMEM.
    while tm > 64 and _vmem_bytes(tm, n_emb) > 36 * 2**20:
        tm = max(64, tm // 2)

    num_tiles = pl.cdiv(n, tm)
    lab = d_label.astype(jnp.int32).reshape(n, 1)

    est = _vmem_bytes(tm, n_emb)
    vmem_limit = int(min(40 * 2**20, max(8 * 2**20, 2 * est)))

    rows = num_tiles * tm
    flops = 2 * rows * (n_emb * 128 + 128 * 128 + 128 * 128)
    bytes_accessed = (n * n_emb * 4 + n * 4
                      + n_emb * 128 * 4 + 2 * 128 * 128 * 2 + 3 * 128 * 4
                      + n * 2 * 4 + num_tiles * 8 * 128 * 4)
    cost = pl.CostEstimate(flops=flops, transcendentals=2 * rows,
                           bytes_accessed=bytes_accessed)

    kernel = functools.partial(_domain_disc_kernel, n, tm)

    logits2, loss_part = pl.pallas_call(
        kernel,
        grid=(num_tiles,),
        in_specs=[
            pl.BlockSpec((tm, n_emb), lambda i: (i, 0)),      # x        (streamed, f32)
            pl.BlockSpec((tm, 1), lambda i: (i, 0)),          # labels   (streamed)
            pl.BlockSpec((n_emb, 128), lambda i: (0, 0)),     # w1       (resident, f32)
            pl.BlockSpec((1, 128), lambda i: (0, 0)),         # b1       (resident)
            pl.BlockSpec((128, 128), lambda i: (0, 0)),       # w2       (resident, bf16)
            pl.BlockSpec((1, 128), lambda i: (0, 0)),         # b2       (resident)
            pl.BlockSpec((128, 128), lambda i: (0, 0)),       # wd_pad   (resident, bf16)
            pl.BlockSpec((1, 128), lambda i: (0, 0)),         # bd_pad   (resident)
        ],
        out_specs=(
            pl.BlockSpec((tm, 2), lambda i: (i, 0)),          # 2 real logit columns
            pl.BlockSpec((8, 128), lambda i: (i, 0)),         # per-tile loss partials
        ),
        out_shape=(
            jax.ShapeDtypeStruct((n, 2), jnp.float32),
            jax.ShapeDtypeStruct((num_tiles * 8, 128), jnp.float32),
        ),
        compiler_params=pltpu.CompilerParams(
            dimension_semantics=("parallel",),
            vmem_limit_bytes=vmem_limit,
        ),
        cost_estimate=cost,
    )(x.astype(jnp.float32), lab,
      prep["w1"], prep["b1"], prep["w2"], prep["b2"],
      prep["wd_pad"], prep["bd_pad"])

    loss = jnp.sum(loss_part[::8, 0]) / jnp.float32(n)
    return logits2, loss


def init_params(key, n_emb):
    """Deterministic parameter init mirroring the module's shapes.

    fc1: Linear(n_emb, 128) -> w1 [n_emb, 128], b1 [1, 128]
    fc2: Linear(128, 128)   -> w2 [128, 128],   b2 [1, 128]
    W_domain: [128, 2] trunc_normal(std=1/sqrt(64)), b_domain: [1, 2] = 0.1
    """
    k1, k2, k3, k4, k5 = jax.random.split(key, 5)

    bound1 = 1.0 / math.sqrt(n_emb)
    w1 = jax.random.uniform(k1, (n_emb, 128), jnp.float32, -bound1, bound1)
    b1 = jax.random.uniform(k2, (1, 128), jnp.float32, -bound1, bound1)

    bound2 = 1.0 / math.sqrt(128.0)
    w2 = jax.random.uniform(k3, (128, 128), jnp.float32, -bound2, bound2)
    b2 = jax.random.uniform(k4, (1, 128), jnp.float32, -bound2, bound2)

    std = 1.0 / math.sqrt(128.0 / 2.0)
    wd = jax.random.truncated_normal(k5, -2.0, 2.0, (128, 2), jnp.float32) * std
    bd = jnp.full((1, 2), 0.1, jnp.float32)

    return {"w1": w1, "b1": b1, "w2": w2, "b2": b2, "wd": wd, "bd": bd}


def _reference_forward(x, d_label, params):
    """Pure-JAX f32 reference of the module's forward pass."""
    h1 = jnp.maximum(x @ params["w1"] + params["b1"], 0.0)
    h2 = jnp.maximum(h1 @ params["w2"] + params["b2"], 0.0)
    logits = h2 @ params["wd"] + params["bd"]
    m = jnp.max(logits, axis=-1, keepdims=True)
    lse = m[:, 0] + jnp.log(jnp.sum(jnp.exp(logits - m), axis=-1))
    picked = jnp.take_along_axis(logits, d_label[:, None].astype(jnp.int32), axis=1)[:, 0]
    return logits, jnp.mean(lse - picked)


if __name__ == "__main__":
    N_EMB = 32
    key = jax.random.PRNGKey(0)
    kx, kl, kp = jax.random.split(key, 3)
    params = init_params(kp, N_EMB)
    prep = prepare_params(params)

    ok = True
    for n in (8, 13):  # 13 exercises the partial-last-block row masking
        kx_i, kl_i = jax.random.split(jax.random.fold_in(kx, n))
        x = jax.random.normal(kx_i, (n, N_EMB), jnp.float32)
        d_label = jax.random.randint(kl_i, (n,), 0, 2, jnp.int32)

        d_logit, domain_loss = domain_discriminator_forward(x, d_label, prep)
        jax.block_until_ready((d_logit, domain_loss))

        ref_logit, ref_loss = _reference_forward(x, d_label, params)

        ok &= d_logit.shape == (n, 2)
        ok &= domain_loss.shape == ()
        ok &= bool(jnp.isfinite(domain_loss))
        # fc1 is f32, fc2/head use bf16 operands with f32 accumulation
        ok &= bool(jnp.allclose(d_logit, ref_logit, atol=5e-2, rtol=5e-2))
        ok &= bool(jnp.allclose(domain_loss, ref_loss, atol=5e-2, rtol=5e-2))

    assert ok
    print("KERNEL_OK")
</pallas_src>

<mosaic_0001>
module attributes {stable_mosaic.version = 11 : i64} {
  func.func @_domain_disc_kernel(%arg0: i32, %arg1: memref<16x32xf32, #tpu.memory_space<vmem>>, %arg2: memref<16x1xi32, #tpu.memory_space<vmem>>, %arg3: memref<32x128xf32, #tpu.memory_space<vmem>>, %arg4: memref<1x128xf32, #tpu.memory_space<vmem>>, %arg5: memref<128x128xbf16, #tpu.memory_space<vmem>>, %arg6: memref<1x128xf32, #tpu.memory_space<vmem>>, %arg7: memref<128x128xbf16, #tpu.memory_space<vmem>>, %arg8: memref<1x128xf32, #tpu.memory_space<vmem>>, %arg9: memref<16x2xf32, #tpu.memory_space<vmem>>, %arg10: memref<8x128xf32, #tpu.memory_space<vmem>>) attributes {dimension_semantics = [#tpu.dimension_semantics<parallel>], iteration_bounds = array<i64: 1>, scalar_prefetch = 0 : i64, scratch_operands = 0 : i64, tpu.core_type = #tpu.core_type<tc>, window_params = [{transform_indices = @transform_0, window_bounds = array<i64: 16, 32>}, {transform_indices = @transform_1, window_bounds = array<i64: 16, 1>}, {pipeline_mode = #tpu.pipeline_mode<synchronous>, transform_indices = @transform_2, window_bounds = array<i64: 32, 128>}, {pipeline_mode = #tpu.pipeline_mode<synchronous>, transform_indices = @transform_3, window_bounds = array<i64: 1, 128>}, {pipeline_mode = #tpu.pipeline_mode<synchronous>, transform_indices = @transform_4, window_bounds = array<i64: 128, 128>}, {pipeline_mode = #tpu.pipeline_mode<synchronous>, transform_indices = @transform_5, window_bounds = array<i64: 1, 128>}, {pipeline_mode = #tpu.pipeline_mode<synchronous>, transform_indices = @transform_6, window_bounds = array<i64: 128, 128>}, {pipeline_mode = #tpu.pipeline_mode<synchronous>, transform_indices = @transform_7, window_bounds = array<i64: 1, 128>}, {transform_indices = @transform_8, window_bounds = array<i64: 16, 2>}, {transform_indices = @transform_9, window_bounds = array<i64: 8, 128>}]} {
    %c0 = arith.constant 0 : index
    %c0_0 = arith.constant 0 : index
    %0 = vector.load %arg1[%c0, %c0_0] : memref<16x32xf32, #tpu.memory_space<vmem>>, vector<16x32xf32>
    %c0_1 = arith.constant 0 : index
    %c0_2 = arith.constant 0 : index
    %1 = vector.load %arg3[%c0_1, %c0_2] : memref<32x128xf32, #tpu.memory_space<vmem>>, vector<32x128xf32>
    %cst = arith.constant dense<0.000000e+00> : vector<16x128xf32>
    %2 = tpu.matmul %0, %1, %cst {dimension_numbers = #tpu.dot_dimension_numbers<[1], [0], [0], [1], [0, 0, 1, 1], [], []>} : vector<16x32xf32>, vector<32x128xf32>, vector<16x128xf32> -> vector<16x128xf32>
    %c0_3 = arith.constant 0 : index
    %c0_4 = arith.constant 0 : index
    %3 = vector.load %arg4[%c0_3, %c0_4] : memref<1x128xf32, #tpu.memory_space<vmem>>, vector<1x128xf32>
    %4 = vector.broadcast %3 : vector<1x128xf32> to vector<16x128xf32>
    %5 = arith.addf %2, %4 : vector<16x128xf32>
    %cst_5 = arith.constant 0.000000e+00 : f32
    %6 = vector.broadcast %cst_5 : f32 to vector<16x128xf32>
    %7 = arith.maximumf %5, %6 : vector<16x128xf32>
    %8 = arith.truncf %7 : vector<16x128xf32> to vector<16x128xbf16>
    %c0_6 = arith.constant 0 : index
    %c0_7 = arith.constant 0 : index
    %9 = vector.load %arg5[%c0_6, %c0_7] : memref<128x128xbf16, #tpu.memory_space<vmem>>, vector<128x128xbf16>
    %cst_8 = arith.constant dense<0.000000e+00> : vector<16x128xf32>
    %10 = tpu.matmul %8, %9, %cst_8 {dimension_numbers = #tpu.dot_dimension_numbers<[1], [0], [0], [1], [0, 0, 1, 1], [], []>} : vector<16x128xbf16>, vector<128x128xbf16>, vector<16x128xf32> -> vector<16x128xf32>
    %c0_9 = arith.constant 0 : index
    %c0_10 = arith.constant 0 : index
    %11 = vector.load %arg6[%c0_9, %c0_10] : memref<1x128xf32, #tpu.memory_space<vmem>>, vector<1x128xf32>
    %12 = vector.broadcast %11 : vector<1x128xf32> to vector<16x128xf32>
    %13 = arith.addf %10, %12 : vector<16x128xf32>
    %cst_11 = arith.constant 0.000000e+00 : f32
    %14 = vector.broadcast %cst_11 : f32 to vector<16x128xf32>
    %15 = arith.maximumf %13, %14 : vector<16x128xf32>
    %16 = arith.truncf %15 : vector<16x128xf32> to vector<16x128xbf16>
    %c0_12 = arith.constant 0 : index
    %c0_13 = arith.constant 0 : index
    %17 = vector.load %arg7[%c0_12, %c0_13] : memref<128x128xbf16, #tpu.memory_space<vmem>>, vector<128x128xbf16>
    %cst_14 = arith.constant dense<0.000000e+00> : vector<16x128xf32>
    %18 = tpu.matmul %16, %17, %cst_14 {dimension_numbers = #tpu.dot_dimension_numbers<[1], [0], [0], [1], [0, 0, 1, 1], [], []>} : vector<16x128xbf16>, vector<128x128xbf16>, vector<16x128xf32> -> vector<16x128xf32>
    %c0_15 = arith.constant 0 : index
    %c0_16 = arith.constant 0 : index
    %19 = vector.load %arg8[%c0_15, %c0_16] : memref<1x128xf32, #tpu.memory_space<vmem>>, vector<1x128xf32>
    %20 = vector.broadcast %19 : vector<1x128xf32> to vector<16x128xf32>
    %21 = arith.addf %18, %20 : vector<16x128xf32>
    %22 = vector.extract_strided_slice %21 {offsets = [0, 0], sizes = [16, 2], strides = [1, 1]} : vector<16x128xf32> to vector<16x2xf32>
    %c0_17 = arith.constant 0 : index
    %c0_18 = arith.constant 0 : index
    %23 = vector.load %arg9[%c0_17, %c0_18] : memref<16x2xf32, #tpu.memory_space<vmem>>, vector<16x2xf32>
    tpu.vector_store %arg9[%c0_17, %c0_18], %22 {strides = array<i32>} : memref<16x2xf32, #tpu.memory_space<vmem>>, vector<16x2xf32>,
    %24 = vector.extract_strided_slice %21 {offsets = [0, 0], sizes = [16, 2], strides = [1, 1]} : vector<16x128xf32> to vector<16x2xf32>
    %cst_19 = arith.constant dense<0xFF800000> : vector<16xf32>
    %25 = vector.multi_reduction <maximumf>, %24, %cst_19 [1] : vector<16x2xf32> to vector<16xf32>
    %26 = vector.shape_cast %25 : vector<16xf32> to vector<16x1xf32>
    %27 = vector.broadcast %26 : vector<16x1xf32> to vector<16x2xf32>
    %28 = arith.subf %24, %27 : vector<16x2xf32>
    %29 = math.exp %28 : vector<16x2xf32>
    %cst_20 = arith.constant dense<0.000000e+00> : vector<16xf32>
    %30 = vector.multi_reduction <add>, %29, %cst_20 [1] : vector<16x2xf32> to vector<16xf32>
    %31 = vector.shape_cast %30 : vector<16xf32> to vector<16x1xf32>
    %32 = math.log %31 : vector<16x1xf32>
    %33 = arith.addf %26, %32 : vector<16x1xf32>
    %c0_21 = arith.constant 0 : index
    %c0_22 = arith.constant 0 : index
    %34 = vector.load %arg2[%c0_21, %c0_22] : memref<16x1xi32, #tpu.memory_space<vmem>>, vector<16x1xi32>
    %c0_i32 = arith.constant 0 : i32
    %35 = vector.broadcast %c0_i32 : i32 to vector<16x1xi32>
    %36 = arith.cmpi eq, %34, %35 : vector<16x1xi32>
    %37 = vector.extract_strided_slice %21 {offsets = [0, 0], sizes = [16, 1], strides = [1, 1]} : vector<16x128xf32> to vector<16x1xf32>
    %38 = vector.extract_strided_slice %21 {offsets = [0, 1], sizes = [16, 1], strides = [1, 1]} : vector<16x128xf32> to vector<16x1xf32>
    %39 = arith.select %36, %37, %38 : vector<16x1xi1>, vector<16x1xf32>
    %c16_i32 = arith.constant 16 : i32
    %40 = arith.muli %arg0, %c16_i32 : i32
    %41 = tpu.iota {dimensions = array<i32: 0>} : vector<16x1xi32>
    %42 = vector.broadcast %40 : i32 to vector<16x1xi32>
    %43 = arith.addi %42, %41 : vector<16x1xi32>
    %c8_i32 = arith.constant 8 : i32
    %44 = vector.broadcast %c8_i32 : i32 to vector<16x1xi32>
    %45 = arith.cmpi slt, %43, %44 : vector<16x1xi32>
    %46 = arith.subf %33, %39 : vector<16x1xf32>
    %cst_23 = arith.constant 0.000000e+00 : f32
    %47 = vector.broadcast %cst_23 : f32 to vector<16x1xf32>
    %48 = arith.select %45, %46, %47 : vector<16x1xi1>, vector<16x1xf32>
    %49 = vector.shape_cast %48 : vector<16x1xf32> to vector<1x16x1xf32>
    %cst_24 = arith.constant dense<0.000000e+00> : vector<1xf32>
    %50 = vector.multi_reduction <add>, %49, %cst_24 [1, 2] : vector<1x16x1xf32> to vector<1xf32>
    %51 = vector.shape_cast %50 : vector<1xf32> to vector<1x1x1xf32>
    %52 = vector.extract %51[0, 0, 0] : f32 from vector<1x1x1xf32>
    %53 = vector.broadcast %52 : f32 to vector<8x128xf32>
    %c0_25 = arith.constant 0 : index
    %c0_26 = arith.constant 0 : index
    %54 = vector.load %arg10[%c0_25, %c0_26] : memref<8x128xf32, #tpu.memory_space<vmem>>, vector<8x128xf32>
    tpu.vector_store %arg10[%c0_25, %c0_26], %53 {strides = array<i32>} : memref<8x128xf32, #tpu.memory_space<vmem>>, vector<8x128xf32>,
    return
  }
  func.func @transform_0(%arg0: i32) -> (i32, i32) {
    %c0_i32 = arith.constant 0 : i32
    %c0_i32_0 = arith.constant 0 : i32
    return %arg0, %c0_i32 : i32, i32
  }
  func.func @transform_1(%arg0: i32) -> (i32, i32) {
    %c0_i32 = arith.constant 0 : i32
    %c0_i32_0 = arith.constant 0 : i32
    return %arg0, %c0_i32 : i32, i32
  }
  func.func @transform_2(%arg0: i32) -> (i32, i32) {
    %c0_i32 = arith.constant 0 : i32
    %c0_i32_0 = arith.constant 0 : i32
    %c0_i32_1 = arith.constant 0 : i32
    return %c0_i32, %c0_i32_0 : i32, i32
  }
  func.func @transform_3(%arg0: i32) -> (i32, i32) {
    %c0_i32 = arith.constant 0 : i32
    %c0_i32_0 = arith.constant 0 : i32
    %c0_i32_1 = arith.constant 0 : i32
    return %c0_i32, %c0_i32_0 : i32, i32
  }
  func.func @transform_4(%arg0: i32) -> (i32, i32) {
    %c0_i32 = arith.constant 0 : i32
    %c0_i32_0 = arith.constant 0 : i32
    %c0_i32_1 = arith.constant 0 : i32
    return %c0_i32, %c0_i32_0 : i32, i32
  }
  func.func @transform_5(%arg0: i32) -> (i32, i32) {
    %c0_i32 = arith.constant 0 : i32
    %c0_i32_0 = arith.constant 0 : i32
    %c0_i32_1 = arith.constant 0 : i32
    return %c0_i32, %c0_i32_0 : i32, i32
  }
  func.func @transform_6(%arg0: i32) -> (i32, i32) {
    %c0_i32 = arith.constant 0 : i32
    %c0_i32_0 = arith.constant 0 : i32
    %c0_i32_1 = arith.constant 0 : i32
    return %c0_i32, %c0_i32_0 : i32, i32
  }
  func.func @transform_7(%arg0: i32) -> (i32, i32) {
    %c0_i32 = arith.constant 0 : i32
    %c0_i32_0 = arith.constant 0 : i32
    %c0_i32_1 = arith.constant 0 : i32
    return %c0_i32, %c0_i32_0 : i32, i32
  }
  func.func @transform_8(%arg0: i32) -> (i32, i32) {
    %c0_i32 = arith.constant 0 : i32
    %c0_i32_0 = arith.constant 0 : i32
    return %arg0, %c0_i32 : i32, i32
  }
  func.func @transform_9(%arg0: i32) -> (i32, i32) {
    %c0_i32 = arith.constant 0 : i32
    %c0_i32_0 = arith.constant 0 : i32
    return %arg0, %c0_i32 : i32, i32
  }
}

</mosaic_0001>

<bundles_post_ra>
// kernel: domain_discriminator_forward.1
= control target key start
LH: loop header
LB: loop body
LE: loop exit
PB: predicated region body
PF: predicated region fallthrough
CT: control target
= control target key end

     0   :  { %15 = vsyncpa [#allocation3], 0  ;;  %s670_s0 = inlined_call_operand.vmem [shape: f32[8,32], index: 0, kind: input, shape index: {}]   ;;  %s671_s1 = inlined_call_operand.vmem [shape: s32[8,1], index: 1, kind: input, shape index: {}]   ;;  %s672_s2 = inlined_call_operand.hbm [shape: f32[32,128], index: 2, kind: input, shape index: {}]   ;;  %s673_s3 = inlined_call_operand.vmem [shape: f32[1,128], index: 3, kind: input, shape index: {}]   ;;  %s674_s4 = inlined_call_operand.hbm [shape: bf16[128,128], index: 4, kind: input, shape index: {}]   ;;  %s675_s5 = inlined_call_operand.vmem [shape: f32[1,128], index: 5, kind: input, shape index: {}]   ;;  %s676_s6 = inlined_call_operand.hbm [shape: bf16[128,128], index: 6, kind: input, shape index: {}]   ;;  %s677_s7 = inlined_call_operand.vmem [shape: f32[1,128], index: 7, kind: input, shape index: {}]   ;;  %s678_s8 = inlined_call_operand.vmem [shape: f32[8,2], index: 8, kind: output, shape index: {0}]   ;;  %s679_s9 = inlined_call_operand.vmem [shape: f32[8,128], index: 9, kind: output, shape index: {1}]  }
   0x1   :  { %16 = vsyncpa [#allocation5], 0  ;;  %s40_s11 = sshll.u32 %s674_s4, 4  ;;  %s579_s12 = smov [#allocation4]   ;;  %s41_s11 = int_to_ptr.hbm [resolvable:$true] %s40_s11 }
   0x2   :  { %s42_s13 = sshll.u32 %s579_s12, 4  ;;  %s25_s16 = sshll.u32 %s672_s2, 4  ;;  %s43_s13 = int_to_ptr.vmem [resolvable:$true] %s42_s13  ;;  %s26_s16 = int_to_ptr.hbm [resolvable:$true] %s25_s16 }
   0x3   :  { %s580_s17 = smov 64   ;;  %s581_s18 = smov 4  }
   0x4   :  { %48 = dma.hbm_to_vmem [thread:$0]  %s41_s11, 1024, %s43_s13, [#allocation5], %s580_s17, %s580_s17, %s581_s18  }
   0x5   :  { %s582_s19 = smov [#allocation2]   ;;  %s583_s21 = smov 128  }
   0x6   :  { %s27_s20 = sshll.u32 %s582_s19, 4  ;;  %s584_s22 = smov 8   ;;  %s28_s20 = int_to_ptr.vmem [resolvable:$true] %s27_s20 }
   0x7   :  { %33 = dma.hbm_to_vmem [thread:$0]  %s26_s16, 512, %s28_s20, [#allocation3], %s583_s21, %s583_s21, %s584_s22  }
   0x8   :  { %s55_s24 = sshll.u32 %s676_s6, 4  ;;  %s585_s25 = smov [#allocation6]   ;;  %s56_s24 = int_to_ptr.hbm [resolvable:$true] %s55_s24 }
   0x9   :  { %s57_s26 = sshll.u32 %s585_s25, 4  ;;  %s58_s26 = int_to_ptr.vmem [resolvable:$true] %s57_s26 }
   0xa   :  { %63 = dma.hbm_to_vmem [thread:$0]  %s56_s24, 1024, %s58_s26, [#allocation5], %s580_s17, %s580_s17, %s581_s18  }
   0xb   :  { %575 = dma.done.wait [#allocation3], 512  }
   0xc   :  { %576 = vsyncadd [#allocation3], 4294966784 }
   0xd   :  { %577 = dma.done.wait [#allocation5], 2048  }
   0xe   :  { %578 = vsyncadd [#allocation5], 4294965248  ;;  %v83_v0 = vld [vmem:[#allocation2 + $0x18] sm:$0xff]  ;;  %v82_v1 = vld [vmem:[#allocation2 + $0x10] sm:$0xff]  ;;  %vm88_vm0 = vcmask 261120   ;;  %vm288_vm1 = vcmask 15360  }
   0xf   :  { %107 = vmatpush.msra.mxu0 %v83_v0  ;;  %v81_v2 = vld [vmem:[#allocation2 + $0x8] sm:$0xff]  ;;  %v477_v3 = vld [vmem:[#allocation4 + $0x38] sm:$0xff]  ;;  %v80_v4 = vld [vmem:[#allocation2] sm:$0xff]  ;;  %s586_s12 = smov 127   ;;  %vm342_vm3 = vcmask 7168  }
  0x10   :  { %189 = vmatpush.bf16.msra.mxu1 %v477_v3  ;;  %v476_v5 = vld [vmem:[#allocation4 + $0x30] sm:$0xff]  ;;  %v78_v6 = vld [vmem:[%s670_s0] sm:$0xff]  ;;  %v475_v7 = vld [vmem:[#allocation4 + $0x28] sm:$0xff] }
  0x11   :  { %108 = vmatpush.msra.mxu0 %v82_v1  ;;  %v474_v8 = vld [vmem:[#allocation4 + $0x20] sm:$0xff]  ;;  %v79_v9 = vld [vmem:[%s670_s0 + $0x8] sm:$0xff]  ;;  %v473_v10 = vld [vmem:[#allocation4 + $0x18] sm:$0xff] }
  0x12   :  { %v472_v11 = vld [vmem:[#allocation4 + $0x10] sm:$0xff]  ;;  %v471_v12 = vld [vmem:[#allocation4 + $0x8] sm:$0xff]  ;;  %v470_v13 = vld [vmem:[#allocation4] sm:$0xff] }
  0x13   :  { %109 = vmatpush.msra.mxu0 %v81_v2  ;;  %v485_v14 = vld [vmem:[#allocation6 + $0x38] sm:$0xff]  ;;  %v484_v15 = vld [vmem:[#allocation6 + $0x30] sm:$0xff]  ;;  %v483_v16 = vld [vmem:[#allocation6 + $0x28] sm:$0xff] }
  0x14   :  { %190 = vmatpush.bf16.msra.mxu1 %v476_v5  ;;  %274 = vmatpush.bf16.msra.mxu2 %v485_v14  ;;  %v482_v17 = vld [vmem:[#allocation6 + $0x20] sm:$0xff]  ;;  %v481_v26 = vld [vmem:[#allocation6 + $0x18] sm:$0xff]  ;;  %v480_v27 = vld [vmem:[#allocation6 + $0x10] sm:$0xff] }
  0x15   :  { %110 = vmatpush.msra.mxu0 %v80_v4  ;;  %v496_v19 = vld [vmem:[%s673_s3] ss:$0 sm:$0xff]  ;;  %v479_v28 = vld [vmem:[#allocation6 + $0x8] sm:$0xff] }
  0x16   :  { %404 = vmatmul.msk.f32.vlgmr.msra.gmra.mxu0 %vm88_vm0, %v78_v6  ;;  %v478_v29 = vld [vmem:[#allocation6] sm:$0xff] }
  0x17   :  { %v497_v31 = vld [vmem:[%s675_s5] ss:$0 sm:$0xff] }
  0x18   :  { %191 = vmatpush.bf16.msra.mxu1 %v475_v7  ;;  %275 = vmatpush.bf16.msra.mxu2 %v484_v15  ;;  %v498_v38 = vld [vmem:[%s677_s7] ss:$0 sm:$0xff] }
  0x19   :  { %v315_v50 = vld [vmem:[%s671_s1] sm:$0xff] }
  0x1a   :  { %vm317_vm2 = vcmp.eq.s32.totalorder %v315_v50, 0 }
  0x1c   :  { %192 = vmatpush.bf16.msra.mxu1 %v474_v8  ;;  %276 = vmatpush.bf16.msra.mxu2 %v483_v16 }
  0x1e   :  { %405 = vmatmul.msk.f32.gmra.mxu0 %vm88_vm0, %v79_v9 }
  0x20   :  { %193 = vmatpush.bf16.msra.mxu1 %v473_v10  ;;  %277 = vmatpush.bf16.msra.mxu2 %v482_v17 }
  0x24   :  { %194 = vmatpush.bf16.msra.mxu1 %v472_v11  ;;  %278 = vmatpush.bf16.msra.mxu2 %v481_v26 }
  0x28   :  { %195 = vmatpush.bf16.msra.mxu1 %v471_v12  ;;  %279 = vmatpush.bf16.msra.mxu2 %v480_v27 }
  0x2c   :  { %196 = vmatpush.bf16.msra.mxu1 %v470_v13  ;;  %280 = vmatpush.bf16.msra.mxu2 %v479_v28 }
  0x30   :  { %281 = vmatpush.bf16.msra.mxu2 %v478_v29 }
  0x93   :  { %v112_v18 = vpop.f32.mrf.mxu0 }
  0x94   :  { %v113_v20 = vadd.f32 %v496_v19, %v112_v18 }
  0x96   :  { %v118_v23 = vmax.f32 %v113_v20, 0.0 }
  0x9b   :  { %v115_v21 = vpop.f32.mrf.mxu0 }
  0x9c   :  { %v116_v22 = vadd.f32 %v496_v19, %v115_v21 }
  0x9e   :  { %v119_v24 = vmax.f32 %v116_v22, 0.0 }
  0xa0   :  { %v120_v25 = vpack.c.bf16 %v119_v24, %v118_v23 }
  0xa2   :  { %197 = vmatmul.bf16.vlgmr.msra.gmra.mxu1 %v120_v25 }
 0x11f   :  { %v198_v30 = vpop.f32.mrf.mxu1 }
 0x120   :  { %v199_v32 = vadd.f32 %v497_v31, %v198_v30 }
 0x122   :  { %v203_v35 = vmax.f32 %v199_v32, 0.0 }
 0x127   :  { %v200_v33 = vpop.f32.mrf.mxu1 }
 0x128   :  { %v201_v34 = vadd.f32 %v497_v31, %v200_v33 }
 0x12a   :  { %v204_v36 = vmax.f32 %v201_v34, 0.0 }
 0x12c   :  { %v205_v37 = vpack.c.bf16 %v204_v36, %v203_v35 }
 0x12e   :  { %282 = vmatmul.bf16.vlgmr.msra.gmra.mxu2 %v205_v37 }
 0x1b1   :  { %v283_v39 = vpop.f32.mrf.mxu2 }
 0x1b2   :  { %v284_v40 = vadd.f32 %v498_v38, %v283_v39 }
 0x1b4   :  { %321 = vrot.lane.b32.xlu1 %v284_v40, %s586_s12  ;;  %v291_v41 = vsel %vm288_vm1, %v284_v40, -inf  ;;  %289 = vst.msk [vmem:[#allocation7] sm:$0xff] %vm288_vm1, %v284_v40 }
 0x1b5   :  { %292 = vmax.xlane.f32.xlu0 %v291_v41 }
 0x1b9   :  { %v285_v42 = vpop.f32.mrf.mxu2 }
 0x1bb   :  { %v387_v43 = vld [vmem:[#allocation7] sm:$0xff] }
 0x1bc   :  { %388 = vst [vmem:[%s678_s8] sm:$0xff] %v387_v43 }
 0x226   :  { %v322_v52 = vpop.permute.xlu1 %321 }
 0x227   :  { %v327_v55 = vsel %vm317_vm2, %v284_v40, %v322_v52 }
 0x228   :  { %v293_v44 = vpop.xlane.xlu0 %292 }
 0x229   :  { %v297_v45 = vsub.f32 %v284_v40, %v293_v44 }
 0x22b   :  { %v299_v46 = vmul.f32 1.442695, %v297_v45 }
 0x22d   :  { %499 = vpow2.f32 %v299_v46 }
 0x233   :  { %v500_v47 = vpop.eup %499 }
 0x234   :  { %v303_v48 = vsel %vm288_vm1, %v500_v47, 0.0 }
 0x235   :  { %304 = vadd.xlane.f32.xlu0 %v303_v48 }
 0x2a8   :  { %v305_v49 = vpop.xlane.xlu0 %304 }
 0x2a9   :  { %501 = vlog2.f32 %v305_v49 }
 0x2af   :  { %v502_v51 = vpop.eup %501 }
 0x2b0   :  { %v310_v53 = vmul.f32 0.6931472, %v502_v51 }
 0x2b2   :  { %v313_v54 = vadd.f32 %v310_v53, %v293_v44 }
 0x2b4   :  { %v338_v56 = vsub.f32 %v313_v54, %v327_v55 }
 0x2b6   :  { %v343_v57 = vsel %vm342_vm3, %v338_v56, 0.0 }
 0x2b7   :  { %346 = vadd.xlane.f32.xlu1 %v343_v57 }
 0x32a   :  { %v347_v58 = vpop.xlane.xlu1 %346 }
 0x32b   :  { %v348_v59 = vrot.slane %v347_v58, 4 }
 0x32d   :  { %v349_v60 = vadd.f32 %v348_v59, %v347_v58 }
 0x32f   :  { %v350_v61 = vrot.slane %v349_v60, 2 }
 0x331   :  { %v351_v62 = vadd.f32 %v350_v61, %v349_v60 }
 0x333   :  { %v352_v63 = vrot.slane %v351_v62, 1 }
 0x335   :  { %v353_v0 = vadd.f32 %v352_v63, %v351_v62 }
 0x337   :  { %486 = vpush %v353_v0 }
 0x368   :  { %s487_s8 = spop %486 }
 0x369   :  { %v355_v1 = vstv %s487_s8 }
 0x36a   :  { %356 = vst [vmem:[%s679_s9] sm:$0xff] %v355_v1 }
 0x36b   :  { %398 = vsyncpa [#allocation3], 1 }
 0x36c   :  { %399 = vsyncpa [#allocation5], 1 }

</bundles_post_ra>
